<compile_context>
chip_gen: v7x
topology: tpu7x:2x2x1
jax: 0.10.0
libtpu: 0.0.40
codegen_flags: <defaults>
</compile_context>

<pallas_src>
import jax
import jax.numpy as jnp
from jax.experimental import pallas as pl
from jax.experimental.pallas import tpu as pltpu


# ----------------------------------------------------------------------------
# Kernel: one batch-block, everything resident in VMEM.
#   enc_ref: (bb, T, H), hid_ref: (bb, H)  ->  out_ref: (bb, T)
# Fuses scores = <enc[b,t,:], hid[b,:]> with a stable softmax over T.
# ----------------------------------------------------------------------------
def attention_kernel(enc_ref, hid_ref, out_ref):
    enc = enc_ref[...]                                   # (bb, T, H) f32
    hid = hid_ref[...]                                   # (bb, H)    f32

    # scores[b, t] = sum_h enc[b, t, h] * hid[b, h]
    # VPU multiply + XLU lane-reduce; H is the lane axis so the reduce is a
    # single cross-lane reduction per (b, t) row. No per-step matmuls/DMAs.
    scores = jnp.sum(enc * hid[:, None, :], axis=-1)     # (bb, T) f32

    # Numerically-stable softmax over the T axis (dim=1 in the PyTorch ref).
    m = jnp.max(scores, axis=-1, keepdims=True)          # (bb, 1)
    e = jnp.exp(scores - m)                              # EUP
    denom = jnp.sum(e, axis=-1, keepdims=True)           # (bb, 1)
    out_ref[...] = (e / denom).astype(out_ref.dtype)


# ----------------------------------------------------------------------------
# Wrapper: single grid point at these sizes (grid = batch blocks, "parallel").
# ----------------------------------------------------------------------------
def attention_forward(hidden, encoder_outputs):
    """hidden: (B, H); encoder_outputs: (B, T, H) -> attn weights (B, T)."""
    B, T, H = encoder_outputs.shape
    assert hidden.shape == (B, H)

    # Whole problem is a few KiB -> keep it as one resident block. If B grows,
    # bb can be shrunk (multiple of 8) to tile the batch across grid steps /
    # the second TensorCore on v7x.
    bb = B
    grid = (pl.cdiv(B, bb),)

    grid_spec = pltpu.PrefetchScalarGridSpec(
        num_scalar_prefetch=0,
        grid=grid,
        in_specs=[
            pl.BlockSpec((bb, T, H), lambda i: (i, 0, 0)),   # encoder_outputs
            pl.BlockSpec((bb, H), lambda i: (i, 0)),         # hidden
        ],
        out_specs=pl.BlockSpec((bb, T), lambda i: (i, 0)),   # attn weights
    )

    return pl.pallas_call(
        attention_kernel,
        out_shape=jax.ShapeDtypeStruct((B, T), jnp.float32),
        grid_spec=grid_spec,
        compiler_params=pltpu.CompilerParams(
            dimension_semantics=("parallel",)),   # batch blocks are independent
    )(encoder_outputs, hidden)


# ----------------------------------------------------------------------------
# Pure-JAX reference for a correctness check.
# ----------------------------------------------------------------------------
def attention_reference(hidden, encoder_outputs):
    scores = jnp.einsum("bth,bh->bt", encoder_outputs, hidden)
    return jax.nn.softmax(scores, axis=1)


if __name__ == "__main__":
    B, T, H = 2, 16, 32

    key = jax.random.PRNGKey(0)
    k_hid, k_enc = jax.random.split(key)
    hidden = jax.random.normal(k_hid, (B, H), dtype=jnp.float32)
    encoder_outputs = jax.random.normal(k_enc, (B, T, H), dtype=jnp.float32)

    attn = attention_forward(hidden, encoder_outputs)
    attn = jax.block_until_ready(attn)

    ref = attention_reference(hidden, encoder_outputs)

    assert attn.shape == (B, T)
    assert jnp.allclose(attn, ref, atol=1e-5, rtol=1e-5)
    # rows are valid probability distributions
    assert jnp.allclose(jnp.sum(attn, axis=1), jnp.ones((B,)), atol=1e-5)

    print("KERNEL_OK")
</pallas_src>

<mosaic_0001>
module attributes {stable_mosaic.version = 11 : i64} {
  func.func @attention_kernel(%arg0: i32, %arg1: memref<2x16x32xf32, #tpu.memory_space<vmem>>, %arg2: memref<2x32xf32, #tpu.memory_space<vmem>>, %arg3: memref<2x16xf32, #tpu.memory_space<vmem>>) attributes {dimension_semantics = [#tpu.dimension_semantics<parallel>], iteration_bounds = array<i64: 1>, scalar_prefetch = 0 : i64, scratch_operands = 0 : i64, tpu.core_type = #tpu.core_type<tc>, window_params = [{transform_indices = @transform_0, window_bounds = array<i64: 2, 16, 32>}, {transform_indices = @transform_1, window_bounds = array<i64: 2, 32>}, {transform_indices = @transform_2, window_bounds = array<i64: 2, 16>}]} {
    %c0 = arith.constant 0 : index
    %c0_0 = arith.constant 0 : index
    %c0_1 = arith.constant 0 : index
    %0 = vector.load %arg1[%c0, %c0_0, %c0_1] : memref<2x16x32xf32, #tpu.memory_space<vmem>>, vector<2x16x32xf32>
    %c0_2 = arith.constant 0 : index
    %c0_3 = arith.constant 0 : index
    %1 = vector.load %arg2[%c0_2, %c0_3] : memref<2x32xf32, #tpu.memory_space<vmem>>, vector<2x32xf32>
    %2 = vector.shape_cast %1 : vector<2x32xf32> to vector<2x1x32xf32>
    %3 = vector.broadcast %2 : vector<2x1x32xf32> to vector<2x16x32xf32>
    %4 = arith.mulf %0, %3 : vector<2x16x32xf32>
    %cst = arith.constant dense<0.000000e+00> : vector<2x16xf32>
    %5 = vector.multi_reduction <add>, %4, %cst [2] : vector<2x16x32xf32> to vector<2x16xf32>
    %cst_4 = arith.constant dense<0xFF800000> : vector<2xf32>
    %6 = vector.multi_reduction <maximumf>, %5, %cst_4 [1] : vector<2x16xf32> to vector<2xf32>
    %7 = vector.shape_cast %6 : vector<2xf32> to vector<2x1xf32>
    %8 = vector.broadcast %7 : vector<2x1xf32> to vector<2x16xf32>
    %9 = arith.subf %5, %8 : vector<2x16xf32>
    %10 = math.exp %9 : vector<2x16xf32>
    %cst_5 = arith.constant dense<0.000000e+00> : vector<2xf32>
    %11 = vector.multi_reduction <add>, %10, %cst_5 [1] : vector<2x16xf32> to vector<2xf32>
    %12 = vector.shape_cast %11 : vector<2xf32> to vector<2x1xf32>
    %13 = vector.broadcast %12 : vector<2x1xf32> to vector<2x16xf32>
    %14 = arith.divf %10, %13 : vector<2x16xf32>
    %c0_6 = arith.constant 0 : index
    %c0_7 = arith.constant 0 : index
    %15 = vector.load %arg3[%c0_6, %c0_7] : memref<2x16xf32, #tpu.memory_space<vmem>>, vector<2x16xf32>
    tpu.vector_store %arg3[%c0_6, %c0_7], %14 {strides = array<i32>} : memref<2x16xf32, #tpu.memory_space<vmem>>, vector<2x16xf32>,
    return
  }
  func.func @transform_0(%arg0: i32) -> (i32, i32, i32) {
    %c0_i32 = arith.constant 0 : i32
    %c0_i32_0 = arith.constant 0 : i32
    %c0_i32_1 = arith.constant 0 : i32
    return %arg0, %c0_i32, %c0_i32_0 : i32, i32, i32
  }
  func.func @transform_1(%arg0: i32) -> (i32, i32) {
    %c0_i32 = arith.constant 0 : i32
    %c0_i32_0 = arith.constant 0 : i32
    return %arg0, %c0_i32 : i32, i32
  }
  func.func @transform_2(%arg0: i32) -> (i32, i32) {
    %c0_i32 = arith.constant 0 : i32
    %c0_i32_0 = arith.constant 0 : i32
    return %arg0, %c0_i32 : i32, i32
  }
}

</mosaic_0001>

<bundles_post_ra>
// kernel: tpu_custom_call.1
= control target key start
LH: loop header
LB: loop body
LE: loop exit
PB: predicated region body
PF: predicated region fallthrough
CT: control target
= control target key end

     0   :  { %7 = vsyncpa [#allocation3], 0  ;;  %s403_s0 = inlined_call_operand.hbm [shape: f32[2,16,32], index: 0, kind: input, shape index: {}]   ;;  %s404_s1 = inlined_call_operand.vmem [shape: f32[2,32], index: 1, kind: input, shape index: {}]   ;;  %s405_s2 = inlined_call_operand.hbm [shape: f32[2,16], index: 2, kind: output, shape index: {}]  }
   0x1   :  { %8 = vsyncpa [#allocation4], 0  ;;  %s314_s9 = smov [#allocation2]   ;;  %s266_s13 = scalar_lea.hbm %s403_s0, 512 }
   0x2   :  { %s14_s10 = sshll.u32 %s314_s9, 4  ;;  %p267_p0 = scmp.ne.s32.totalorder %s403_s0, %s266_s13  ;;  %s15_s10 = int_to_ptr.vmem [resolvable:$true] %s14_s10 }
   0x3   :  { %p270_p1 = scmp.lt.u32.totalorder %s266_s13, %s403_s0 }
   0x5   :  { %p272_p2 = pnand %p270_p1, %p267_p0 }
   0x7   :  { %275 = shalt.err (!%p272_p2)
}
   0x8   :  { %s276_s18 = scalar_lea.vmem %s15_s10, 512  ;;  %p281_p4 = scmp.lt.s32.totalorder %s15_s10, %s15_s10 }
   0x9   :  { %p277_p3 = scmp.ne.s32.totalorder %s15_s10, %s276_s18  ;;  %p282_p5 = scmp.lt.s32.totalorder %s276_s18, %s276_s18 }
   0xb   :  { %p283_p6 = por %p282_p5, %p281_p4 }
   0xd   :  { %p284_p7 = pnand %p283_p6, %p277_p3 }
   0xf   :  { %287 = shalt.err (!%p284_p7)
}
  0x10   :  { %s315_s19 = smov 128   ;;  %s316_s20 = smov 8  }
  0x11   :  { %20 = dma.hbm_to_vmem [thread:$0]  %s403_s0, 512, %s15_s10, [#allocation3], %s315_s19, %s315_s19, %s316_s20  }
  0x12   :  { %310 = dma.done.wait [#allocation3], 512  }
  0x13   :  { %311 = vsyncadd [#allocation3], 4294966784  ;;  %v43_v0 = vlaneseq  ;;  %v317_v1 = vmov 1966171168   ;;  %v26_v12 = vld [vmem:[#allocation2] sm:$0xff]  ;;  %v27_v13 = vld [vmem:[#allocation2 + $0x8] sm:$0xff] }
  0x14   :  { %v41_v2 = vunpack.c.l.s4 %v317_v1  ;;  %v245_v9 = vld.sshfl [vmem:[%s404_s1] sm:$0x11 pattern:$0x75316420]  ;;  %vm68_vm0 = vcmask 261120   ;;  %v28_v16 = vld [vmem:[#allocation2 + $0x10] sm:$0xff] }
  0x15   :  { %v347_v3 = vshrl.u32 %v43_v0, 7  ;;  %v86_v4 = vand.u32 127, %v43_v0  ;;  %v39_v11 = vcombine.high %v245_v9, %v245_v9  ;;  %v29_v17 = vld [vmem:[#allocation2 + $0x18] sm:$0xff]  ;;  %vm96_vm1 = vcmask 130112   ;;  %s319_s0 = smov [#allocation5]  }
  0x16   :  { %v42_v5 = vunpack.c.0.s8 %v41_v2  ;;  %vm107_vm2 = vcmask 1041409   ;;  %vm110_vm3 = vcmask 123904   ;;  %v318_v41 = vmov 0   ;;  %s236_s1 = sshll.u32 %s319_s0, 4  ;;  %s237_s1 = int_to_ptr.vmem [resolvable:$true] %s236_s1 }
  0x17   :  { %v350_v6 = vsub.s32 %v86_v4, %v347_v3  ;;  %v354_v8 = vsub.s32 0, %v347_v3  ;;  %v91_v27 = vadd.s32 4294967288, %v86_v4  ;;  %253 = vset.pattern.permute.xlu0 %v318_v41  ;;  %252 = vset.pattern.permute.xlu1 %v318_v41  ;;  %v121_v42 = vsub.s32 1, %v347_v3  ;;  %s288_s25 = scalar_lea.vmem %s237_s1, 32  ;;  %p293_p9 = scmp.lt.s32.totalorder %s237_s1, %s237_s1 }
  0x18   :  { %v45_v7 = vsub.s32 %v42_v5, %v347_v3  ;;  %p289_p8 = scmp.ne.s32.totalorder %s237_s1, %s288_s25  ;;  %p294_p10 = scmp.lt.s32.totalorder %s288_s25, %s288_s25 }
  0x19   :  { %v362_v28 = vsub.s32 %v91_v27, %v347_v3 }
  0x1a   :  { %v46_v10 = vrot.slane %v245_v9, %v45_v7  ;;  %v53_v15 = vrot.slane %v39_v11, %v45_v7  ;;  %p295_p11 = por %p294_p10, %p293_p9 }
  0x1c   :  { %v57_v14 = vrot.slane %v46_v10, %v354_v8  ;;  %v61_v19 = vrot.slane %v53_v15, %v354_v8  ;;  %p296_p12 = pnand %p295_p11, %p289_p8 }
  0x1e   :  { %v64_v18 = vmul.f32 %v57_v14, %v26_v12  ;;  %v65_v20 = vmul.f32 %v57_v14, %v27_v13  ;;  %v66_v22 = vmul.f32 %v61_v19, %v28_v16  ;;  %v67_v23 = vmul.f32 %v61_v19, %v29_v17 }
  0x20   :  { %v69_v21 = vsel %vm68_vm0, %v64_v18, 0.0  ;;  %v75_v24 = vsel %vm68_vm0, %v66_v22, 0.0  ;;  %v72_v25 = vsel %vm68_vm0, %v65_v20, 0.0  ;;  %v78_v26 = vsel %vm68_vm0, %v67_v23, 0.0 }
  0x21   :  { %70 = vadd.xlane.f32.xlu0 %v69_v21  ;;  %76 = vadd.xlane.f32.xlu1 %v75_v24 }
  0x25   :  { %73 = vadd.xlane.f32.xlu0 %v72_v25  ;;  %79 = vadd.xlane.f32.xlu1 %v78_v26 }
  0xae   :  { %v71_v29 = vpop.xlane.xlu0 %70  ;;  %v77_v30 = vpop.xlane.xlu1 %76 }
  0xaf   :  { %v90_v34 = vrot.slane %v71_v29, %v350_v6  ;;  %v101_v35 = vrot.slane %v77_v30, %v350_v6 }
  0xb2   :  { %v74_v31 = vpop.xlane.xlu0 %73  ;;  %v80_v33 = vpop.xlane.xlu1 %79 }
  0xb3   :  { %v95_v32 = vrot.slane %v74_v31, %v362_v28  ;;  %v105_v36 = vrot.slane %v80_v33, %v362_v28 }
  0xb5   :  { %v97_v37 = vsel %vm96_vm1, %v95_v32, %v90_v34  ;;  %v106_v38 = vsel %vm96_vm1, %v105_v36, %v101_v35 }
  0xb6   :  { %v108_v39 = vsel %vm107_vm2, %v106_v38, %v97_v37 }
  0xb7   :  { %v111_v40 = vsel %vm110_vm3, %v108_v39, -inf }
  0xb8   :  { %112 = vmax.xlane.f32.xlu0 %v111_v40 }
 0x145   :  { %v113_v43 = vpop.xlane.xlu0 %112 }
 0x146   :  { %v118_v44 = vrot.slane %v113_v43, %v354_v8  ;;  %v122_v45 = vrot.slane %v113_v43, %v121_v42 }
 0x148   :  { %v125_v46 = vsub.f32 %v71_v29, %v118_v44  ;;  %v126_v47 = vsub.f32 %v74_v31, %v118_v44  ;;  %v127_v48 = vsub.f32 %v77_v30, %v122_v45  ;;  %v128_v51 = vsub.f32 %v80_v33, %v122_v45 }
 0x14a   :  { %v129_v49 = vmul.f32 1.442695, %v125_v46  ;;  %v131_v50 = vmul.f32 1.442695, %v126_v47  ;;  %v133_v52 = vmul.f32 1.442695, %v127_v48 }
 0x14b   :  { %v135_v53 = vmul.f32 1.442695, %v128_v51 }
 0x14c   :  { %254 = vpow2.f32 %v129_v49 }
 0x14d   :  { %256 = vpow2.f32 %v131_v50 }
 0x14e   :  { %258 = vpow2.f32 %v133_v52 }
 0x14f   :  { %260 = vpow2.f32 %v135_v53 }
 0x156   :  { %v255_v54 = vpop.eup %254 }
 0x157   :  { %v257_v55 = vpop.eup %256  ;;  %142 = vperm.xlu1 %252, %v255_v54  }
 0x158   :  { %145 = vperm.xlu0 %253, %v257_v55   ;;  %v259_v56 = vpop.eup %258 }
 0x159   :  { %v261_v57 = vpop.eup %260 }
 0x15b   :  { %148 = vperm.xlu1 %252, %v259_v56  }
 0x15f   :  { %151 = vperm.xlu1 %252, %v261_v57  }
 0x1d6   :  { %v143_v58 = vpop.permute.xlu1 %142 }
 0x1d7   :  { %v146_v59 = vpop.permute.xlu0 %145  ;;  %v156_v62 = vrot.slane %v143_v58, %v350_v6 }
 0x1d8   :  { %v160_v61 = vrot.slane %v146_v59, %v362_v28 }
 0x1da   :  { %v149_v60 = vpop.permute.xlu1 %148  ;;  %v161_v2 = vsel %vm96_vm1, %v160_v61, %v156_v62 }
 0x1db   :  { %v165_v0 = vrot.slane %v149_v60, %v350_v6 }
 0x1de   :  { %v152_v63 = vpop.permute.xlu1 %151 }
 0x1df   :  { %v169_v1 = vrot.slane %v152_v63, %v362_v28 }
 0x1e1   :  { %v170_v3 = vsel %vm96_vm1, %v169_v1, %v165_v0 }
 0x1e2   :  { %v171_v4 = vsel %vm107_vm2, %v170_v3, %v161_v2 }
 0x1e3   :  { %v173_v5 = vsel %vm110_vm3, %v171_v4, 0.0 }
 0x1e4   :  { %174 = vadd.xlane.f32.xlu1 %v173_v5 }
 0x271   :  { %v175_v7 = vpop.xlane.xlu1 %174 }
 0x272   :  { %v180_v9 = vrot.slane %v175_v7, %v354_v8  ;;  %v184_v10 = vrot.slane %v175_v7, %v121_v42 }
 0x274   :  { %262 = vrcp.f32 %v180_v9 }
 0x275   :  { %264 = vrcp.f32 %v184_v10 }
 0x27e   :  { %v263_v11 = vpop.eup %262 }
 0x27f   :  { %v188_v12 = vmul.f32 %v263_v11, %v255_v54  ;;  %v189_v13 = vmul.f32 %v263_v11, %v257_v55  ;;  %v265_v14 = vpop.eup %264 }
 0x280   :  { %v191_v15 = vmul.f32 %v265_v14, %v259_v56  ;;  %v192_v16 = vmul.f32 %v265_v14, %v261_v57 }
 0x281   :  { %198 = vperm.xlu0 %253, %v188_v12  }
 0x285   :  { %201 = vperm.xlu0 %253, %v189_v13  }
 0x289   :  { %204 = vperm.xlu0 %253, %v191_v15  }
 0x28d   :  { %207 = vperm.xlu0 %253, %v192_v16  }
 0x300   :  { %v199_v17 = vpop.permute.xlu0 %198 }
 0x301   :  { %v212_v8 = vrot.slane %v199_v17, %v350_v6 }
 0x304   :  { %v202_v18 = vpop.permute.xlu0 %201 }
 0x305   :  { %v216_v20 = vrot.slane %v202_v18, %v362_v28 }
 0x307   :  { %v217_v24 = vsel %vm96_vm1, %v216_v20, %v212_v8 }
 0x308   :  { %v205_v19 = vpop.permute.xlu0 %204 }
 0x309   :  { %v221_v22 = vrot.slane %v205_v19, %v350_v6 }
 0x30c   :  { %v208_v21 = vpop.permute.xlu0 %207 }
 0x30d   :  { %v225_v23 = vrot.slane %v208_v21, %v362_v28 }
 0x30f   :  { %v226_v25 = vsel %vm96_vm1, %v225_v23, %v221_v22 }
 0x310   :  { %v227_v26 = vsel %vm107_vm2, %v226_v25, %v217_v24 }
 0x311   :  { %229 = vst.msk [vmem:[#allocation5] sm:$0x3] %vm110_vm3, %v227_v26 }
 0x312   :  { %299 = shalt.err (!%p296_p12)
}
 0x313   :  { %s300_s28 = scalar_lea.hbm %s405_s2, 32 }
 0x314   :  { %p301_p13 = scmp.ne.s32.totalorder %s405_s2, %s300_s28  ;;  %p304_p0 = scmp.lt.u32.totalorder %s300_s28, %s405_s2 }
 0x316   :  { %p306_p1 = pnand %p304_p0, %p301_p13 }
 0x318   :  { %309 = shalt.err (!%p306_p1)
}
 0x319   :  { %239 = dma.vmem_to_hbm [thread:$0]  %s237_s1, 32, %s405_s2, [#allocation4]  }
 0x31a   :  { %312 = dma.done.wait [#allocation4], 32  }
 0x31b   :  { %313 = vsyncadd [#allocation4], 4294967264 }
 0x31c   :  { %243 = vsyncpa [#allocation3], 1 }
 0x31d   :  { %244 = vsyncpa [#allocation4], 1 }

</bundles_post_ra>
